<compile_context>
chip_gen: v6e
topology: v6e:2x2x1
jax: 0.10.0
libtpu: 0.0.40
codegen_flags: <defaults>
</compile_context>

<pallas_src>
import jax
import jax.numpy as jnp
from jax.experimental import pallas as pl
from jax.experimental.pallas import tpu as pltpu

# ----------------------------- config ---------------------------------------
B = 2            # batch_size
S = 8            # subword sequence length
H = 32           # hidden_size (n_out)
L = 4            # num_hidden_layers (n_layers mixed by ScalarMix)
VOCAB = 64       # vocab_size
PAD_INDEX = 0    # config.pad_token_id
LANE = 128       # TPU lane width


# ----------------------------- Pallas kernel --------------------------------
def autolm_kernel(sub_ref,    # [TM, 1]      int32 (VMEM)  token ids (per tile)
                  table_ref,  # [VP, HP]     f32   (VMEM)  padded embedding table
                  w_ref,      # [L, HP, HP]  bf16  (VMEM)  padded per-layer weights
                  b_ref,      # [L, HP]      f32   (VMEM)  padded per-layer biases
                  coef_ref,   # [L]          f32   (SMEM)  gamma * softmax(mix_w)
                  out_ref):   # [TM, HP]     f32   (VMEM)
    TM, HP = out_ref.shape
    VP = table_ref.shape[0]
    NL = w_ref.shape[0]

    ids = sub_ref[...]                                            # [TM, 1] int32

    # ---- attention mask: subwords.ne(pad_index), broadcast hoisted once ------
    mask_b = jnp.broadcast_to((ids != PAD_INDEX).astype(jnp.float32), (TM, HP))

    # ---- fused embedding lookup: one-hot @ table on the MXU ------------------
    cols = jax.lax.broadcasted_iota(jnp.int32, (TM, VP), 1)       # [TM, VP]
    onehot = (cols == ids).astype(jnp.float32)                    # [TM, VP]
    h = jnp.dot(onehot, table_ref[...], preferred_element_type=jnp.float32)
    h = h * mask_b                                                # zero padded rows

    # ---- synthetic LM layers + on-the-fly ScalarMix ---------------------------
    acc = jnp.zeros((TM, HP), dtype=jnp.float32)
    for l in range(NL):                                           # static, L small
        z = jnp.dot(h.astype(jnp.bfloat16), w_ref[l],
                    preferred_element_type=jnp.float32) + b_ref[l][None, :]
        h = jax.nn.gelu(z) * mask_b
        acc = acc + coef_ref[l] * h                               # coef = gamma*softmax(w)

    out_ref[...] = acc


# ----------------------------- wrapper ---------------------------------------
def auto_lm_embedding(subwords, tok_emb, layer_w, layer_b, mix_w, gamma):
    """subwords [B,S] int32 -> embeddings [B,S,H] f32."""
    Bx, Sx = subwords.shape
    M = Bx * Sx
    V, Hx = tok_emb.shape
    Lx = layer_w.shape[0]

    # pad hidden dim and vocab to lane width (zero-padding keeps the math exact:
    # padded weight rows/cols and bias entries are 0, gelu(0)=0).
    HP = ((Hx + LANE - 1) // LANE) * LANE
    VP = ((V + LANE - 1) // LANE) * LANE

    table = jnp.zeros((VP, HP), jnp.float32).at[:V, :Hx].set(tok_emb)
    w_pad = (jnp.zeros((Lx, HP, HP), jnp.float32)
             .at[:, :Hx, :Hx].set(layer_w)).astype(jnp.bfloat16)
    b_pad = jnp.zeros((Lx, HP), jnp.float32).at[:, :Hx].set(layer_b)

    # ScalarMix scalars precomputed outside the kernel (eval mode, no dropout)
    coef = (gamma[0] * jax.nn.softmax(mix_w)).astype(jnp.float32)  # [L]

    sub = subwords.reshape(M, 1).astype(jnp.int32)

    TM = 8                     # token tile (multiple of 8 sublanes)
    assert M % TM == 0
    grid = (M // TM,)

    out = pl.pallas_call(
        autolm_kernel,
        out_shape=jax.ShapeDtypeStruct((M, HP), jnp.float32),
        grid=grid,
        in_specs=[
            pl.BlockSpec((TM, 1), lambda i: (i, 0)),             # token ids, tiled
            pl.BlockSpec((VP, HP), lambda i: (0, 0)),            # table, resident
            pl.BlockSpec((Lx, HP, HP), lambda i: (0, 0, 0)),     # weights, resident
            pl.BlockSpec((Lx, HP), lambda i: (0, 0)),            # biases, resident
            pl.BlockSpec(memory_space=pltpu.MemorySpace.SMEM),   # coef scalars
        ],
        out_specs=pl.BlockSpec((TM, HP), lambda i: (i, 0)),      # lane-dense output
        compiler_params=pltpu.CompilerParams(
            dimension_semantics=("parallel",),
            vmem_limit_bytes=16 * 1024 * 1024),
    )(sub, table, w_pad, b_pad, coef)

    return out[:, :Hx].reshape(Bx, Sx, Hx)


# ----------------------------- pure-JAX reference -----------------------------
def reference(subwords, tok_emb, layer_w, layer_b, mix_w, gamma):
    mask = (subwords != PAD_INDEX).astype(jnp.float32)[..., None]   # [B,S,1]
    h = tok_emb[subwords] * mask                                    # [B,S,H]
    s = jax.nn.softmax(mix_w)
    w_bf = layer_w.astype(jnp.bfloat16).astype(jnp.float32)
    acc = jnp.zeros_like(h)
    for l in range(layer_w.shape[0]):
        hl = h.astype(jnp.bfloat16).astype(jnp.float32)
        z = jnp.einsum('bsh,hk->bsk', hl, w_bf[l],
                       precision=jax.lax.Precision.HIGHEST) + layer_b[l]
        h = jax.nn.gelu(z) * mask
        acc = acc + s[l] * h
    return gamma[0] * acc


# ----------------------------- main ------------------------------------------
if __name__ == "__main__":
    key = jax.random.PRNGKey(0)
    k_tok, k_emb, k_w, k_b = jax.random.split(key, 4)

    # deterministic "token ids" with some padding at the tail of each sequence
    subwords = jax.random.randint(k_tok, (B, S), 1, VOCAB, dtype=jnp.int32)
    subwords = subwords.at[:, -2:].set(PAD_INDEX)                   # pad tokens

    # deterministic synthetic LM parameters
    tok_emb = jax.random.normal(k_emb, (VOCAB, H), dtype=jnp.float32) * 0.1
    layer_w = jax.random.normal(k_w, (L, H, H), dtype=jnp.float32) * (1.0 / jnp.sqrt(H))
    layer_b = jax.random.normal(k_b, (L, H), dtype=jnp.float32) * 0.01

    # ScalarMix parameters, initialized exactly as in the PyTorch module
    mix_w = jnp.zeros((L,), dtype=jnp.float32)      # nn.Parameter(torch.zeros(n_layers))
    gamma = jnp.ones((1,), dtype=jnp.float32)       # nn.Parameter(torch.tensor([1.0]))

    out = auto_lm_embedding(subwords, tok_emb, layer_w, layer_b, mix_w, gamma)
    jax.block_until_ready(out)

    ref = reference(subwords, tok_emb, layer_w, layer_b, mix_w, gamma)
    assert out.shape == (B, S, H) and out.dtype == jnp.float32
    assert jnp.allclose(out, ref, rtol=1e-2, atol=1e-2), \
        f"max abs err = {jnp.max(jnp.abs(out - ref))}"
    print("KERNEL_OK")
</pallas_src>

<mosaic_0001>
module attributes {stable_mosaic.version = 11 : i64} {
  func.func @autolm_kernel(%arg0: i32, %arg1: memref<8x1xi32, #tpu.memory_space<vmem>>, %arg2: memref<128x128xf32, #tpu.memory_space<vmem>>, %arg3: memref<4x128x128xbf16, #tpu.memory_space<vmem>>, %arg4: memref<4x128xf32, #tpu.memory_space<vmem>>, %arg5: memref<4xf32, #tpu.memory_space<smem>>, %arg6: memref<8x128xf32, #tpu.memory_space<vmem>>) attributes {dimension_semantics = [#tpu.dimension_semantics<parallel>], iteration_bounds = array<i64: 2>, scalar_prefetch = 0 : i64, scratch_operands = 0 : i64, tpu.core_type = #tpu.core_type<tc>, window_params = [{transform_indices = @transform_0, window_bounds = array<i64: 8, 1>}, {pipeline_mode = #tpu.pipeline_mode<synchronous>, transform_indices = @transform_1, window_bounds = array<i64: 128, 128>}, {pipeline_mode = #tpu.pipeline_mode<synchronous>, transform_indices = @transform_2, window_bounds = array<i64: 4, 128, 128>}, {pipeline_mode = #tpu.pipeline_mode<synchronous>, transform_indices = @transform_3, window_bounds = array<i64: 4, 128>}, {transform_indices = @transform_4, window_bounds = array<i64: 4>}, {transform_indices = @transform_5, window_bounds = array<i64: 8, 128>}]} {
    %c0 = arith.constant 0 : index
    %c0_0 = arith.constant 0 : index
    %0 = vector.load %arg1[%c0, %c0_0] : memref<8x1xi32, #tpu.memory_space<vmem>>, vector<8x1xi32>
    %c0_i32 = arith.constant 0 : i32
    %1 = vector.broadcast %c0_i32 : i32 to vector<8x1xi32>
    %2 = arith.cmpi ne, %0, %1 : vector<8x1xi32>
    %3 = arith.extui %2 : vector<8x1xi1> to vector<8x1xi32>
    %4 = arith.sitofp %3 : vector<8x1xi32> to vector<8x1xf32>
    %5 = vector.shape_cast %4 : vector<8x1xf32> to vector<8x1xf32>
    %6 = vector.broadcast %5 : vector<8x1xf32> to vector<8x128xf32>
    %7 = tpu.iota {dimensions = array<i32: 1>} : vector<8x128xi32>
    %8 = vector.broadcast %0 : vector<8x1xi32> to vector<8x128xi32>
    %9 = arith.cmpi eq, %7, %8 : vector<8x128xi32>
    %10 = arith.extui %9 : vector<8x128xi1> to vector<8x128xi32>
    %11 = arith.sitofp %10 : vector<8x128xi32> to vector<8x128xf32>
    %c0_1 = arith.constant 0 : index
    %c0_2 = arith.constant 0 : index
    %12 = vector.load %arg2[%c0_1, %c0_2] : memref<128x128xf32, #tpu.memory_space<vmem>>, vector<128x128xf32>
    %cst = arith.constant dense<0.000000e+00> : vector<8x128xf32>
    %13 = tpu.matmul %11, %12, %cst {dimension_numbers = #tpu.dot_dimension_numbers<[1], [0], [0], [1], [0, 0, 1, 1], [], []>} : vector<8x128xf32>, vector<128x128xf32>, vector<8x128xf32> -> vector<8x128xf32>
    %14 = arith.mulf %13, %6 : vector<8x128xf32>
    %cst_3 = arith.constant 0.000000e+00 : f32
    %15 = vector.broadcast %cst_3 : f32 to vector<8x128xf32>
    %16 = arith.truncf %14 : vector<8x128xf32> to vector<8x128xbf16>
    %c0_4 = arith.constant 0 : index
    %c0_5 = arith.constant 0 : index
    %c0_6 = arith.constant 0 : index
    %17 = vector.load %arg3[%c0_4, %c0_5, %c0_6] : memref<4x128x128xbf16, #tpu.memory_space<vmem>>, vector<1x128x128xbf16>
    %18 = vector.shape_cast %17 : vector<1x128x128xbf16> to vector<128x128xbf16>
    %cst_7 = arith.constant dense<0.000000e+00> : vector<8x128xf32>
    %19 = tpu.matmul %16, %18, %cst_7 {dimension_numbers = #tpu.dot_dimension_numbers<[1], [0], [0], [1], [0, 0, 1, 1], [], []>} : vector<8x128xbf16>, vector<128x128xbf16>, vector<8x128xf32> -> vector<8x128xf32>
    %c0_8 = arith.constant 0 : index
    %c0_9 = arith.constant 0 : index
    %20 = vector.load %arg4[%c0_8, %c0_9] : memref<4x128xf32, #tpu.memory_space<vmem>>, vector<1x128xf32>
    %21 = vector.shape_cast %20 : vector<1x128xf32> to vector<128xf32>
    %22 = vector.shape_cast %21 : vector<128xf32> to vector<1x128xf32>
    %23 = vector.broadcast %22 : vector<1x128xf32> to vector<8x128xf32>
    %24 = arith.addf %19, %23 : vector<8x128xf32>
    %25 = arith.mulf %24, %24 : vector<8x128xf32>
    %26 = arith.mulf %24, %25 : vector<8x128xf32>
    %cst_10 = arith.constant 4.471500e-02 : f32
    %27 = vector.broadcast %cst_10 : f32 to vector<8x128xf32>
    %28 = arith.mulf %27, %26 : vector<8x128xf32>
    %29 = arith.addf %24, %28 : vector<8x128xf32>
    %cst_11 = arith.constant 0.797884583 : f32
    %30 = vector.broadcast %cst_11 : f32 to vector<8x128xf32>
    %31 = arith.mulf %30, %29 : vector<8x128xf32>
    %32 = math.tanh %31 : vector<8x128xf32>
    %cst_12 = arith.constant 1.000000e+00 : f32
    %33 = vector.broadcast %cst_12 : f32 to vector<8x128xf32>
    %34 = arith.addf %33, %32 : vector<8x128xf32>
    %cst_13 = arith.constant 5.000000e-01 : f32
    %35 = vector.broadcast %cst_13 : f32 to vector<8x128xf32>
    %36 = arith.mulf %35, %34 : vector<8x128xf32>
    %37 = arith.mulf %24, %36 : vector<8x128xf32>
    %38 = arith.mulf %37, %6 : vector<8x128xf32>
    %c0_14 = arith.constant 0 : index
    %39 = memref.load %arg5[%c0_14] : memref<4xf32, #tpu.memory_space<smem>>
    %40 = vector.broadcast %39 : f32 to vector<8x128xf32>
    %41 = arith.mulf %40, %38 : vector<8x128xf32>
    %42 = arith.addf %15, %41 : vector<8x128xf32>
    %43 = arith.truncf %38 : vector<8x128xf32> to vector<8x128xbf16>
    %c1 = arith.constant 1 : index
    %c0_15 = arith.constant 0 : index
    %c0_16 = arith.constant 0 : index
    %44 = vector.load %arg3[%c1, %c0_15, %c0_16] : memref<4x128x128xbf16, #tpu.memory_space<vmem>>, vector<1x128x128xbf16>
    %45 = vector.shape_cast %44 : vector<1x128x128xbf16> to vector<128x128xbf16>
    %cst_17 = arith.constant dense<0.000000e+00> : vector<8x128xf32>
    %46 = tpu.matmul %43, %45, %cst_17 {dimension_numbers = #tpu.dot_dimension_numbers<[1], [0], [0], [1], [0, 0, 1, 1], [], []>} : vector<8x128xbf16>, vector<128x128xbf16>, vector<8x128xf32> -> vector<8x128xf32>
    %c1_18 = arith.constant 1 : index
    %c0_19 = arith.constant 0 : index
    %47 = vector.load %arg4[%c1_18, %c0_19] : memref<4x128xf32, #tpu.memory_space<vmem>>, vector<1x128xf32>
    %48 = vector.shape_cast %47 : vector<1x128xf32> to vector<128xf32>
    %49 = vector.shape_cast %48 : vector<128xf32> to vector<1x128xf32>
    %50 = vector.broadcast %49 : vector<1x128xf32> to vector<8x128xf32>
    %51 = arith.addf %46, %50 : vector<8x128xf32>
    %52 = arith.mulf %51, %51 : vector<8x128xf32>
    %53 = arith.mulf %51, %52 : vector<8x128xf32>
    %cst_20 = arith.constant 4.471500e-02 : f32
    %54 = vector.broadcast %cst_20 : f32 to vector<8x128xf32>
    %55 = arith.mulf %54, %53 : vector<8x128xf32>
    %56 = arith.addf %51, %55 : vector<8x128xf32>
    %cst_21 = arith.constant 0.797884583 : f32
    %57 = vector.broadcast %cst_21 : f32 to vector<8x128xf32>
    %58 = arith.mulf %57, %56 : vector<8x128xf32>
    %59 = math.tanh %58 : vector<8x128xf32>
    %cst_22 = arith.constant 1.000000e+00 : f32
    %60 = vector.broadcast %cst_22 : f32 to vector<8x128xf32>
    %61 = arith.addf %60, %59 : vector<8x128xf32>
    %cst_23 = arith.constant 5.000000e-01 : f32
    %62 = vector.broadcast %cst_23 : f32 to vector<8x128xf32>
    %63 = arith.mulf %62, %61 : vector<8x128xf32>
    %64 = arith.mulf %51, %63 : vector<8x128xf32>
    %65 = arith.mulf %64, %6 : vector<8x128xf32>
    %c1_24 = arith.constant 1 : index
    %66 = memref.load %arg5[%c1_24] : memref<4xf32, #tpu.memory_space<smem>>
    %67 = vector.broadcast %66 : f32 to vector<8x128xf32>
    %68 = arith.mulf %67, %65 : vector<8x128xf32>
    %69 = arith.addf %42, %68 : vector<8x128xf32>
    %70 = arith.truncf %65 : vector<8x128xf32> to vector<8x128xbf16>
    %c2 = arith.constant 2 : index
    %c0_25 = arith.constant 0 : index
    %c0_26 = arith.constant 0 : index
    %71 = vector.load %arg3[%c2, %c0_25, %c0_26] : memref<4x128x128xbf16, #tpu.memory_space<vmem>>, vector<1x128x128xbf16>
    %72 = vector.shape_cast %71 : vector<1x128x128xbf16> to vector<128x128xbf16>
    %cst_27 = arith.constant dense<0.000000e+00> : vector<8x128xf32>
    %73 = tpu.matmul %70, %72, %cst_27 {dimension_numbers = #tpu.dot_dimension_numbers<[1], [0], [0], [1], [0, 0, 1, 1], [], []>} : vector<8x128xbf16>, vector<128x128xbf16>, vector<8x128xf32> -> vector<8x128xf32>
    %c2_28 = arith.constant 2 : index
    %c0_29 = arith.constant 0 : index
    %74 = vector.load %arg4[%c2_28, %c0_29] : memref<4x128xf32, #tpu.memory_space<vmem>>, vector<1x128xf32>
    %75 = vector.shape_cast %74 : vector<1x128xf32> to vector<128xf32>
    %76 = vector.shape_cast %75 : vector<128xf32> to vector<1x128xf32>
    %77 = vector.broadcast %76 : vector<1x128xf32> to vector<8x128xf32>
    %78 = arith.addf %73, %77 : vector<8x128xf32>
    %79 = arith.mulf %78, %78 : vector<8x128xf32>
    %80 = arith.mulf %78, %79 : vector<8x128xf32>
    %cst_30 = arith.constant 4.471500e-02 : f32
    %81 = vector.broadcast %cst_30 : f32 to vector<8x128xf32>
    %82 = arith.mulf %81, %80 : vector<8x128xf32>
    %83 = arith.addf %78, %82 : vector<8x128xf32>
    %cst_31 = arith.constant 0.797884583 : f32
    %84 = vector.broadcast %cst_31 : f32 to vector<8x128xf32>
    %85 = arith.mulf %84, %83 : vector<8x128xf32>
    %86 = math.tanh %85 : vector<8x128xf32>
    %cst_32 = arith.constant 1.000000e+00 : f32
    %87 = vector.broadcast %cst_32 : f32 to vector<8x128xf32>
    %88 = arith.addf %87, %86 : vector<8x128xf32>
    %cst_33 = arith.constant 5.000000e-01 : f32
    %89 = vector.broadcast %cst_33 : f32 to vector<8x128xf32>
    %90 = arith.mulf %89, %88 : vector<8x128xf32>
    %91 = arith.mulf %78, %90 : vector<8x128xf32>
    %92 = arith.mulf %91, %6 : vector<8x128xf32>
    %c2_34 = arith.constant 2 : index
    %93 = memref.load %arg5[%c2_34] : memref<4xf32, #tpu.memory_space<smem>>
    %94 = vector.broadcast %93 : f32 to vector<8x128xf32>
    %95 = arith.mulf %94, %92 : vector<8x128xf32>
    %96 = arith.addf %69, %95 : vector<8x128xf32>
    %97 = arith.truncf %92 : vector<8x128xf32> to vector<8x128xbf16>
    %c3 = arith.constant 3 : index
    %c0_35 = arith.constant 0 : index
    %c0_36 = arith.constant 0 : index
    %98 = vector.load %arg3[%c3, %c0_35, %c0_36] : memref<4x128x128xbf16, #tpu.memory_space<vmem>>, vector<1x128x128xbf16>
    %99 = vector.shape_cast %98 : vector<1x128x128xbf16> to vector<128x128xbf16>
    %cst_37 = arith.constant dense<0.000000e+00> : vector<8x128xf32>
    %100 = tpu.matmul %97, %99, %cst_37 {dimension_numbers = #tpu.dot_dimension_numbers<[1], [0], [0], [1], [0, 0, 1, 1], [], []>} : vector<8x128xbf16>, vector<128x128xbf16>, vector<8x128xf32> -> vector<8x128xf32>
    %c3_38 = arith.constant 3 : index
    %c0_39 = arith.constant 0 : index
    %101 = vector.load %arg4[%c3_38, %c0_39] : memref<4x128xf32, #tpu.memory_space<vmem>>, vector<1x128xf32>
    %102 = vector.shape_cast %101 : vector<1x128xf32> to vector<128xf32>
    %103 = vector.shape_cast %102 : vector<128xf32> to vector<1x128xf32>
    %104 = vector.broadcast %103 : vector<1x128xf32> to vector<8x128xf32>
    %105 = arith.addf %100, %104 : vector<8x128xf32>
    %106 = arith.mulf %105, %105 : vector<8x128xf32>
    %107 = arith.mulf %105, %106 : vector<8x128xf32>
    %cst_40 = arith.constant 4.471500e-02 : f32
    %108 = vector.broadcast %cst_40 : f32 to vector<8x128xf32>
    %109 = arith.mulf %108, %107 : vector<8x128xf32>
    %110 = arith.addf %105, %109 : vector<8x128xf32>
    %cst_41 = arith.constant 0.797884583 : f32
    %111 = vector.broadcast %cst_41 : f32 to vector<8x128xf32>
    %112 = arith.mulf %111, %110 : vector<8x128xf32>
    %113 = math.tanh %112 : vector<8x128xf32>
    %cst_42 = arith.constant 1.000000e+00 : f32
    %114 = vector.broadcast %cst_42 : f32 to vector<8x128xf32>
    %115 = arith.addf %114, %113 : vector<8x128xf32>
    %cst_43 = arith.constant 5.000000e-01 : f32
    %116 = vector.broadcast %cst_43 : f32 to vector<8x128xf32>
    %117 = arith.mulf %116, %115 : vector<8x128xf32>
    %118 = arith.mulf %105, %117 : vector<8x128xf32>
    %119 = arith.mulf %118, %6 : vector<8x128xf32>
    %c3_44 = arith.constant 3 : index
    %120 = memref.load %arg5[%c3_44] : memref<4xf32, #tpu.memory_space<smem>>
    %121 = vector.broadcast %120 : f32 to vector<8x128xf32>
    %122 = arith.mulf %121, %119 : vector<8x128xf32>
    %123 = arith.addf %96, %122 : vector<8x128xf32>
    %c0_45 = arith.constant 0 : index
    %c0_46 = arith.constant 0 : index
    %124 = vector.load %arg6[%c0_45, %c0_46] : memref<8x128xf32, #tpu.memory_space<vmem>>, vector<8x128xf32>
    tpu.vector_store %arg6[%c0_45, %c0_46], %123 {strides = array<i32>} : memref<8x128xf32, #tpu.memory_space<vmem>>, vector<8x128xf32>,
    return
  }
  func.func @transform_0(%arg0: i32) -> (i32, i32) {
    %c0_i32 = arith.constant 0 : i32
    %c0_i32_0 = arith.constant 0 : i32
    return %arg0, %c0_i32 : i32, i32
  }
  func.func @transform_1(%arg0: i32) -> (i32, i32) {
    %c0_i32 = arith.constant 0 : i32
    %c0_i32_0 = arith.constant 0 : i32
    %c0_i32_1 = arith.constant 0 : i32
    return %c0_i32, %c0_i32_0 : i32, i32
  }
  func.func @transform_2(%arg0: i32) -> (i32, i32, i32) {
    %c0_i32 = arith.constant 0 : i32
    %c0_i32_0 = arith.constant 0 : i32
    %c0_i32_1 = arith.constant 0 : i32
    %c0_i32_2 = arith.constant 0 : i32
    return %c0_i32, %c0_i32_0, %c0_i32_1 : i32, i32, i32
  }
  func.func @transform_3(%arg0: i32) -> (i32, i32) {
    %c0_i32 = arith.constant 0 : i32
    %c0_i32_0 = arith.constant 0 : i32
    %c0_i32_1 = arith.constant 0 : i32
    return %c0_i32, %c0_i32_0 : i32, i32
  }
  func.func @transform_4(%arg0: i32) -> i32 {
    %c0_i32 = arith.constant 0 : i32
    %c0_i32_0 = arith.constant 0 : i32
    return %c0_i32 : i32
  }
  func.func @transform_5(%arg0: i32) -> (i32, i32) {
    %c0_i32 = arith.constant 0 : i32
    %c0_i32_0 = arith.constant 0 : i32
    return %arg0, %c0_i32 : i32, i32
  }
}

</mosaic_0001>

<bundles_post_ra>
// kernel: tpu_custom_call.1
= control target key start
LH: loop header
LB: loop body
LE: loop exit
PB: predicated region body
PF: predicated region fallthrough
CT: control target
= control target key end

     0   :  { %10 = vsyncpa [#allocation3], 0  ;;  %s1722_s0 = inlined_call_operand.vmem [shape: s32[16,1], index: 0, kind: input, shape index: {}]   ;;  %s1723_s1 = inlined_call_operand.hbm [shape: f32[128,128], index: 1, kind: input, shape index: {}]   ;;  %s1724_s2 = inlined_call_operand.hbm [shape: bf16[4,128,128], index: 2, kind: input, shape index: {}]   ;;  %s1725_s3 = inlined_call_operand.vmem [shape: f32[4,128], index: 3, kind: input, shape index: {}]   ;;  %s1726_s4 = inlined_call_operand.vmem [shape: f32[4], index: 4, kind: input, shape index: {}]   ;;  %s1727_s5 = inlined_call_operand.hbm [shape: f32[16,128], index: 5, kind: output, shape index: {}]  }
   0x1   :  { %11 = vsyncpa [#allocation7], 0 }
   0x2   :  { %12 = vsyncpa [#allocation5], 0 }
   0x3   :  { %13 = vsyncpa [#allocation4], 0 }
   0x4   :  { %15 = vsyncpa [#allocation4 + $0x1], 0  ;;  %s1504_s18 = smov 0   ;;  %s1506_s19 = smov 0  }
   0x5   :  { %s1508_s20 = smov 0   ;;  %s1510_s21 = smov 0  }
   0x6 LB: > { %s1525_s22 = sadd.s32 4294967295, %s1460_s21   ;;  %s976_s23 = sadd.s32 4294967294, %s1460_s21   ;;  %s1460_s21 = sphi %s1510_s21, %s1743_s21   ;;  %s1456_s20 = sphi %s1508_s20, %s1742_s20   ;;  %s1452_s19 = sphi %s1506_s19, %s1741_s19   ;;  %s1448_s18 = sphi %s1504_s18, %s1740_s18  }
   0x7   : > { %s1529_s24 = sadd.s32 1, %s1460_s21   ;;  %s138_s25 = sadd.s32 1, %s1456_s20 }
   0x8   : > { %s135_s26 = ssub.s32 %s1460_s21, %s1529_s24  ;;  %p148_p0 = scmp.ne.s32.totalorder %s1456_s20, %s1452_s19 }
   0x9   : > { %p136_p1 = scmp.eq.s32.totalorder %s135_s26, 0  ;;  %p149_p2 = scmp.eq.s32.totalorder %s1525_s22, 1 }
   0xa   : > { %p154_p3 = scmp.ne.s32.totalorder %s1452_s19, %s1448_s18  ;;  %p155_p4 = scmp.eq.s32.totalorder %s976_s23, 1 }
   0xb   : > { %s1540_s27 = scalar_select %p136_p1, %s1456_s20, %s138_s25  }
   0xc   : > { %p1542_p5 = por %p149_p2, %p148_p0  ;;  %p1546_p6 = por %p155_p4, %p154_p3 }
   0xd   : > { %p977_p7 = scmp.ge.s32.totalorder %s1460_s21, 1  ;;  %p162_p8 = scmp.lt.s32.totalorder %s1460_s21, 3 }
   0xe   : > { %s1730_s29 = scalar_select %p1546_p6, 1, 0 }
   0xf   : > { %p1728_p9 = scmp.eq.s32.totalorder %s1525_s22, 0  ;;  %p1553_p10 = pnand %p977_p7, %p162_p8 }
  0x10   : > { %s1462_s6 = smov [#allocation2]   ;;  %s1463_s9 = smov [#allocation6]  }
  0x11   : > { %s174_s7 = sshll.u32 %s1462_s6, 4  ;;  %p1216_p11 = pneg %p1553_p10  ;;  %s175_s7 = int_to_ptr.vmem [resolvable:$true] %s174_s7 }
  0x12   : > { %s187_s10 = sshll.u32 %s1463_s9, 4  ;;  %s1332_s11 = scalar_lea.vmem %s175_s7, 2048  ;;  %s188_s10 = int_to_ptr.vmem [resolvable:$true] %s187_s10 }
  0x13   : > { %p1561_p12 = pnand %p1728_p9, %p1216_p11  ;;  %p1333_p0 = scmp.ne.s32.totalorder %s175_s7, %s1332_s11 }
  0x14   : > { %p1340_p3 = scmp.lt.s32.totalorder %s175_s7, %s175_s7  ;;  %p1341_p4 = scmp.lt.s32.totalorder %s1332_s11, %s1332_s11 }
  0x15   : > { %p1323_p13 = pneg %p1561_p12 }
  0x16   : > { %p1342_p7 = por %p1341_p4, %p1340_p3 }
  0x17   : > { %p1335_p1 = pnand %p1333_p0, %p1323_p13 }
  0x19   : > { %p1336_p2 = pneg %p1335_p1 }
  0x1b   : > { %p1343_p8 = pnand %p1342_p7, %p1336_p2 }
  0x1d   : > { %1346 = shalt.err (!%p1343_p8)
}
  0x1e   : > { %s1464_s12 = smov 128   ;;  %s1465_s13 = smov 8  }
  0x1f   : > { %1219 = dma.hbm_to_vmem [thread:$0]  (!%p1561_p12), %s1723_s1, 2048, %s175_s7, [#allocation3], %s1464_s12, %s1464_s12, %s1465_s13  }
  0x20   : > { %s1358_s16 = scalar_lea.vmem %s188_s10, 4096  ;;  %p1366_p9 = scmp.lt.s32.totalorder %s188_s10, %s188_s10 }
  0x21   : > { %p1359_p11 = scmp.ne.s32.totalorder %s188_s10, %s1358_s16  ;;  %p1367_p6 = scmp.lt.s32.totalorder %s1358_s16, %s1358_s16 }
  0x23   : > { %p1361_p0 = pnand %p1359_p11, %p1323_p13  ;;  %p1368_p3 = por %p1367_p6, %p1366_p9 }
  0x25   : > { %p1362_p1 = pneg %p1361_p0 }
  0x27   : > { %p1369_p2 = pnand %p1368_p3, %p1362_p1 }
  0x29   : > { %1372 = shalt.err (!%p1369_p2)
}
  0x2a   : > { %s1466_s17 = smov 64   ;;  %s1467_s23 = smov 4  }
  0x2b   : > { %1222 = dma.hbm_to_vmem [thread:$0]  (!%p1561_p12), %s1724_s2, 4096, %s188_s10, [#allocation7], %s1466_s17, %s1466_s17, %s1467_s23  }
  0x2c   : > { %s204_s9 = sshll.u32 %s1726_s4, 4  ;;  %s205_s9 = int_to_ptr.vmem [resolvable:$true] %s204_s9 }
  0x2d   : > { %s1373_s11 = scalar_lea.vmem %s205_s9, 16  ;;  %p1381_p7 = scmp.lt.s32.totalorder %s205_s9, %s205_s9 }
  0x2e   : > { %p1374_p4 = scmp.ne.s32.totalorder %s205_s9, %s1373_s11  ;;  %p1382_p8 = scmp.lt.s32.totalorder %s1373_s11, %s1373_s11 }
  0x30   : > { %p1376_p6 = pnand %p1374_p4, %p1323_p13  ;;  %p1383_p11 = por %p1382_p8, %p1381_p7 }
  0x32   : > { %p1377_p9 = pneg %p1376_p6 }
  0x34   : > { %p1384_p0 = pnand %p1383_p11, %p1377_p9 }
  0x36   : > { %1387 = shalt.err (!%p1384_p0)
}
  0x37   : > { %s1468_s12 = smov [#allocation8]   ;;  %224 = sbr.rel (%p1553_p10) target bundleno = 1330 (0x532), region = 40 }
  0x38   : > { %1225 = dma.vmem_to_smem (!%p1561_p12), %s205_s9, 16, %s1468_s12, [#allocation5]  }
  0x39   : > { %p1733_p1 = scmp.eq.s32.totalorder (!%p1553_p10), %s1525_s22, 0 }
  0x3c   : > { %1431 = dma.done.wait (%p1733_p1), [#allocation3], 2048   ;;  %p1734_p3 = pmov %p1733_p1 }
  0x3d   : > { %p1735_p13 = pmov %p1733_p1 }
  0x3e   : > { %1433 = vsyncadd (%p1734_p3), [#allocation3], 4294965248 }
  0x3f   : > { %1435 = dma.done.wait (%p1735_p13), [#allocation7], 4096   ;;  %p1736_p2 = pmov %p1733_p1 }
  0x40   : > { %p1737_p4 = pmov %p1733_p1 }
  0x41   : > { %1437 = vsyncadd (%p1736_p2), [#allocation7], 4294963200 }
  0x42   : > { %1439 = dma.done.wait (%p1737_p4), [#allocation5], 16   ;;  %p1738_p12 = pmov %p1733_p1 }
  0x44   : > { %1441 = vsyncadd (%p1738_p12), [#allocation5], 4294967280 }
  0x45   : > { %238 = sfence }
  0x46   : > { %p260_p10 = scmp.lt.s32.totalorder %s1525_s22, 1  ;;  %v297_v0 = vld [vmem:[#allocation2 + $0x78] sm:$0xff]  ;;  %v1469_v1 = vmov 0   ;;  %v1470_v2 = vmov 0.0   ;;  %v296_v3 = vld [vmem:[#allocation2 + $0x70] sm:$0xff]  ;;  %v295_v4 = vld [vmem:[#allocation2 + $0x68] sm:$0xff]  ;;  %v274_v27 = vlaneseq }
  0x47   : > { %1280 = vset.pattern.permute.xlu0 %v1469_v1  ;;  %1087 = vmatprep.subr.mxu0 %v1470_v2  ;;  %vm1471_vm0 = vmmov 0   ;;  %v294_v5 = vld [vmem:[#allocation2 + $0x60] sm:$0xff]  ;;  %v1281_v7 = vld [vmem:[#allocation6 + $0x38] sm:$0xff]   ;;  %v1282_v10 = vld [vmem:[#allocation6 + $0x30] sm:$0xff]   ;;  %v1472_v30 = vmov 1.0   ;;  %s489_s25 = sld [smem:[#allocation8]] }
  0x48   : > { %s261_s30 = scalar_select %p260_p10, %s1525_s22, 1  ;;  %1088 = vmatpush3.msra.mxu0 %v297_v0  ;;  %1122 = vmatprep.subr.bf16.mxu1 %v1470_v2  ;;  %v293_v8 = vld [vmem:[#allocation2 + $0x58] sm:$0xff]  ;;  %v292_v11 = vld [vmem:[#allocation2 + $0x50] sm:$0xff]  ;;  %v291_v12 = vld [vmem:[#allocation2 + $0x48] sm:$0xff]  ;;  %v275_v28 = vand.u32 127, %v274_v27 }
  0x49   : > { %1089 = vmatprep.subr.mxu0 %v1470_v2  ;;  %1119 = vmatprep.mubr.msk.f32.mxu0 %vm1471_vm0, %v1470_v2  ;;  %v290_v13 = vld [vmem:[#allocation2 + $0x40] sm:$0xff]  ;;  %v1283_v14 = vld [vmem:[#allocation6 + $0x28] sm:$0xff]   ;;  %v289_v15 = vld [vmem:[#allocation2 + $0x38] sm:$0xff]  ;;  %s1009_s26 = sld [smem:[#allocation8 + $0x1]]  ;;  %s1031_s13 = sshll.u32 %s1525_s22, 7 }
  0x4a   : > { %s987_s8 = sshll.u32 %s261_s30, 3  ;;  %1090 = vmatpush3.msra.mxu0 %v296_v3  ;;  %1138 = vmatprep.mubr.msk.bf16.mxu1 %vm1471_vm0, %v1470_v2  ;;  %v1284_v16 = vld [vmem:[#allocation6 + $0x20] sm:$0xff]   ;;  %v288_v17 = vld [vmem:[#allocation2 + $0x30] sm:$0xff]  ;;  %v287_v18 = vld [vmem:[#allocation2 + $0x28] sm:$0xff]  ;;  %s1019_s9 = sld [smem:[#allocation8 + $0x2]] }
  0x4b   : > { %s263_s14 = scalar_lea.vmem %s1722_s0, %s987_s8  ;;  %1091 = vmatprep.subr.mxu0 %v1470_v2  ;;  %1123 = vmatpush3.bf16.msra.mxu1 %v1281_v7  ;;  %v1285_v19 = vld [vmem:[#allocation6 + $0x18] sm:$0xff]   ;;  %v286_v20 = vld [vmem:[#allocation2 + $0x20] sm:$0xff]  ;;  %v1286_v22 = vld [vmem:[#allocation6 + $0x10] sm:$0xff]   ;;  %s1029_s30 = sld [smem:[#allocation8 + $0x3]] }
  0x4c   : > { %v265_v6 = vld [vmem:[%s263_s14] sm:$0xff]  ;;  %1092 = vmatpush3.msra.mxu0 %v295_v4  ;;  %1124 = vmatprep.subr.bf16.mxu1 %v1470_v2  ;;  %v285_v21 = vld [vmem:[#allocation2 + $0x18] sm:$0xff]  ;;  %v284_v23 = vld [vmem:[#allocation2 + $0x10] sm:$0xff]  ;;  %s257_s8 = sand.u32 1, %s1452_s19   ;;  %s881_s23 = scalar_lea.hbm %s1727_s5, %s1031_s13 }
  0x4d   : > { %277 = vperm.xlu0 %1280, %v265_v6   ;;  %vm266_vm1 = vcmp.ne.s32.totalorder %v265_v6, 0  ;;  %1093 = vmatprep.subr.mxu0 %v1470_v2  ;;  %v283_v24 = vld [vmem:[#allocation2 + $0x8] sm:$0xff]  ;;  %v282_v26 = vld [vmem:[#allocation2] sm:$0xff]  ;;  %v1289_v37 = vld [vmem:[#allocation6 + $0x78] sm:$0xff]   ;;  %s986_s10 = sshll.u32 %s257_s8, 3  ;;  %s1473_s6 = smov [#allocation9]  }
  0x4e   : > { %v988_v9 = vsel %vm266_vm1, 1.0, %v1470_v2  ;;  %1094 = vmatpush3.msra.mxu0 %v294_v5  ;;  %v1287_v25 = vld [vmem:[#allocation6 + $0x8] sm:$0xff]   ;;  %v1288_v31 = vld [vmem:[#allocation6] sm:$0xff]   ;;  %v1290_v38 = vld [vmem:[#allocation6 + $0x70] sm:$0xff]   ;;  %s259_s14 = scalar_lea.vmem [#allocation9], %s986_s10  ;;  %s1392_s7 = sshll.u32 %s1473_s6, 4  ;;  %s1393_s7 = int_to_ptr.vmem [resolvable:$false] %s1392_s7 }
  0x4f   : > { %1095 = vmatprep.subr.mxu0 %v1470_v2  ;;  %1125 = vmatpush3.bf16.msra.mxu1 %v1282_v10  ;;  %v1291_v39 = vld [vmem:[#allocation6 + $0x68] sm:$0xff]   ;;  %v1292_v40 = vld [vmem:[#allocation6 + $0x60] sm:$0xff]   ;;  %v1293_v41 = vld [vmem:[#allocation6 + $0x58] sm:$0xff]   ;;  %s883_s15 = sshll.u32 %s259_s14, 4  ;;  %s1394_s22 = scalar_lea.vmem %s1393_s7, 256  ;;  %s884_s15 = int_to_ptr.vmem [resolvable:$true] %s883_s15 }
  0x50   : > { %1096 = vmatpush3.msra.mxu0 %v293_v8  ;;  %1126 = vmatprep.subr.bf16.mxu1 %v1470_v2  ;;  %v1294_v42 = vld [vmem:[#allocation6 + $0x50] sm:$0xff]   ;;  %v1295_v43 = vld [vmem:[#allocation6 + $0x48] sm:$0xff]   ;;  %v1296_v44 = vld [vmem:[#allocation6 + $0x40] sm:$0xff]   ;;  %p1395_p8 = scmp.lt.s32.totalorder %s884_s15, %s1393_s7 }
  0x51   : > { %271 = vperm.xlu0 %1280, %v988_v9   ;;  %1097 = vmatprep.subr.mxu0 %v1470_v2  ;;  %v991_v45 = vld [vmem:[%s1725_s3] ss:$0 sm:$0xff]  ;;  %v1297_v62 = vld [vmem:[#allocation6 + $0xb8] sm:$0xff]   ;;  %v1298_v63 = vld [vmem:[#allocation6 + $0xb0] sm:$0xff]  }
  0x52   : > { %1098 = vmatpush3.msra.mxu0 %v292_v11  ;;  %v1299_v0 = vld [vmem:[#allocation6 + $0xa8] sm:$0xff]   ;;  %v1300_v1 = vld [vmem:[#allocation6 + $0xa0] sm:$0xff]   ;;  %v1301_v3 = vld [vmem:[#allocation6 + $0x98] sm:$0xff]  }
  0x53   : > { %1099 = vmatprep.subr.mxu0 %v1470_v2  ;;  %1127 = vmatpush3.bf16.msra.mxu1 %v1283_v14  ;;  %v1302_v4 = vld [vmem:[#allocation6 + $0x90] sm:$0xff]   ;;  %v1303_v5 = vld [vmem:[#allocation6 + $0x88] sm:$0xff]   ;;  %v1304_v6 = vld [vmem:[#allocation6 + $0x80] sm:$0xff]  }
  0x54   : > { %1100 = vmatpush3.msra.mxu0 %v291_v12  ;;  %1128 = vmatprep.subr.bf16.mxu1 %v1470_v2  ;;  %v1000_v7 = vld [vmem:[%s1725_s3 + $0x1] ss:$0 sm:$0xff] }
  0x55   : > { %1101 = vmatprep.subr.mxu0 %v1470_v2 }
  0x56   : > { %1102 = vmatpush3.msra.mxu0 %v290_v13 }
  0x57   : > { %1103 = vmatprep.subr.mxu0 %v1470_v2  ;;  %1129 = vmatpush3.bf16.msra.mxu1 %v1284_v16 }
  0x58   : > { %1104 = vmatpush3.msra.mxu0 %v289_v15  ;;  %1130 = vmatprep.subr.bf16.mxu1 %v1470_v2 }
  0x59   : > { %1105 = vmatprep.subr.mxu0 %v1470_v2 }
  0x5a   : > { %1106 = vmatpush3.msra.mxu0 %v288_v17 }
  0x5b   : > { %1107 = vmatprep.subr.mxu0 %v1470_v2  ;;  %1131 = vmatpush3.bf16.msra.mxu1 %v1285_v19 }
  0x5c   : > { %1108 = vmatpush3.msra.mxu0 %v287_v18  ;;  %1132 = vmatprep.subr.bf16.mxu1 %v1470_v2 }
  0x5d   : > { %1109 = vmatprep.subr.mxu0 %v1470_v2 }
  0x5e   : > { %1110 = vmatpush3.msra.mxu0 %v286_v20 }
  0x5f   : > { %1111 = vmatprep.subr.mxu0 %v1470_v2  ;;  %1133 = vmatpush3.bf16.msra.mxu1 %v1286_v22  ;;  %v490_v22 = vstv %s489_s25  ;;  %s870_s25 = scalar_lea.sflag [#allocation4], %s257_s8 }
  0x60   : > { %1112 = vmatpush3.msra.mxu0 %v285_v21  ;;  %1134 = vmatprep.subr.bf16.mxu1 %v1470_v2 }
  0x61   : > { %1113 = vmatprep.subr.mxu0 %v1470_v2 }
  0x62   : > { %1114 = vmatpush3.msra.mxu0 %v284_v23  ;;  %v615_v23 = vstv %s1009_s26  ;;  %s1388_s26 = scalar_lea.vmem %s884_s15, 128 }
  0x63   : > { %1115 = vmatprep.subr.mxu0 %v1470_v2  ;;  %1135 = vmatpush3.bf16.msra.mxu1 %v1287_v25  ;;  %p1389_p6 = scmp.ne.s32.totalorder %s884_s15, %s1388_s26  ;;  %p1396_p11 = scmp.lt.s32.totalorder %s1394_s22, %s1388_s26 }
  0x64   : > { %1116 = vmatpush3.msra.mxu0 %v283_v24  ;;  %1136 = vmatprep.subr.bf16.mxu1 %v1470_v2 }
  0x65   : > { %1117 = vmatprep.subr.mxu0 %v1470_v2  ;;  %p1390_p9 = pnand %p1389_p6, %p1542_p5  ;;  %p1397_p0 = por %p1396_p11, %p1395_p8 }
  0x66   : > { %1118 = vmatpush3.msra.mxu0 %v282_v26 }
  0x67   : > { %1142 = vmatprep.subr.bf16.mxu0 %v1470_v2  ;;  %1137 = vmatpush3.bf16.msra.mxu1 %v1288_v31  ;;  %v1307_v31 = vld [vmem:[#allocation6 + $0xe8] sm:$0xff]   ;;  %p1391_p7 = pneg %p1390_p9 }
  0x68   : > { %1162 = vmatprep.subr.bf16.mxu1 %v1470_v2 }
  0x69   : > { %p1398_p1 = pnand %p1397_p0, %p1391_p7 }
  0xc8   : > { %v278_v29 = vpop.permute.xlu0 %277 }
  0xc9   : > { %vm279_vm2 = vcmp.eq.s32.totalorder %v275_v28, %v278_v29  ;;  %v1305_v29 = vld [vmem:[#allocation6 + $0xf8] sm:$0xff]  }
  0xca   : > { %1120 = vmatmul.mubr.msk.f32.vlgmr.msra.gmra.mxu0 %vm279_vm2, %v1472_v30  ;;  %v1306_v30 = vld [vmem:[#allocation6 + $0xf0] sm:$0xff]  }
  0xcb   : > { %1158 = vmatprep.mubr.msk.bf16.mxu0 %vm1471_vm0, %v1470_v2  ;;  %1143 = vmatpush3.bf16.msra.mxu0 %v1289_v37  ;;  %v1312_v37 = vld [vmem:[#allocation6 + $0xc0] sm:$0xff]  }
  0xcc   : > { %v1643_v32 = vpop.permute.xlu0 %271  ;;  %1144 = vmatprep.subr.bf16.mxu0 %v1470_v2 }
  0xcf   : > { %1145 = vmatpush3.bf16.msra.mxu0 %v1290_v38  ;;  %v1010_v38 = vld [vmem:[%s1725_s3 + $0x2] ss:$0 sm:$0xff] }
  0xd0   : > { %1146 = vmatprep.subr.bf16.mxu0 %v1470_v2 }
  0xd3   : > { %1147 = vmatpush3.bf16.msra.mxu0 %v1291_v39 }
  0xd4   : > { %1148 = vmatprep.subr.bf16.mxu0 %v1470_v2 }
  0xd7   : > { %1149 = vmatpush3.bf16.msra.mxu0 %v1292_v40 }
  0xd8   : > { %1150 = vmatprep.subr.bf16.mxu0 %v1470_v2 }
  0xdb   : > { %1151 = vmatpush3.bf16.msra.mxu0 %v1293_v41 }
  0xdc   : > { %1152 = vmatprep.subr.bf16.mxu0 %v1470_v2 }
  0xdf   : > { %1153 = vmatpush3.bf16.msra.mxu0 %v1294_v42 }
  0xe0   : > { %1154 = vmatprep.subr.bf16.mxu0 %v1470_v2 }
  0xe3   : > { %1155 = vmatpush3.bf16.msra.mxu0 %v1295_v43 }
  0xe4   : > { %1156 = vmatprep.subr.bf16.mxu0 %v1470_v2 }
  0xe7   : > { %1157 = vmatpush3.bf16.msra.mxu0 %v1296_v44 }
  0xe8   : > { %1182 = vmatprep.subr.bf16.mxu0 %v1470_v2 }
 0x18a   : > { %v364_v33 = vpop.f32.mrf.mxu0 }
 0x18b   : > { %v368_v34 = vmul.f32 %v364_v33, %v1643_v32  ;;  %v1308_v33 = vld [vmem:[#allocation6 + $0xe0] sm:$0xff]  }
 0x18c   : > { %v1121_v35 = vpop.f32.mrf.mxu0 }
 0x18d   : > { %v369_v36 = vpack.c.bf16 %v368_v34, %v368_v34  ;;  %v1309_v34 = vld [vmem:[#allocation6 + $0xd8] sm:$0xff]   ;;  %v1310_v35 = vld [vmem:[#allocation6 + $0xd0] sm:$0xff]  }
 0x18f   : > { %1139 = vmatmul.mubr.bf16.vlgmr.msra.gmra.mxu1 %v369_v36  ;;  %v1311_v36 = vld [vmem:[#allocation6 + $0xc8] sm:$0xff]  }
 0x190   : > { %1178 = vmatprep.mubr.msk.bf16.mxu1 %vm1471_vm0, %v1470_v2  ;;  %1163 = vmatpush3.bf16.msra.mxu1 %v1297_v62 }
 0x191   : > { %1164 = vmatprep.subr.bf16.mxu1 %v1470_v2 }
 0x194   : > { %1165 = vmatpush3.bf16.msra.mxu1 %v1298_v63 }
 0x195   : > { %1166 = vmatprep.subr.bf16.mxu1 %v1470_v2 }
 0x198   : > { %1167 = vmatpush3.bf16.msra.mxu1 %v1299_v0 }
 0x199   : > { %1168 = vmatprep.subr.bf16.mxu1 %v1470_v2 }
 0x19c   : > { %1169 = vmatpush3.bf16.msra.mxu1 %v1300_v1 }
 0x19d   : > { %1170 = vmatprep.subr.bf16.mxu1 %v1470_v2 }
 0x1a0   : > { %1171 = vmatpush3.bf16.msra.mxu1 %v1301_v3 }
 0x1a1   : > { %1172 = vmatprep.subr.bf16.mxu1 %v1470_v2 }
 0x1a4   : > { %1173 = vmatpush3.bf16.msra.mxu1 %v1302_v4 }
 0x1a5   : > { %1174 = vmatprep.subr.bf16.mxu1 %v1470_v2 }
 0x1a8   : > { %1175 = vmatpush3.bf16.msra.mxu1 %v1303_v5 }
 0x1a9   : > { %1176 = vmatprep.subr.bf16.mxu1 %v1470_v2 }
 0x1ac   : > { %1177 = vmatpush3.bf16.msra.mxu1 %v1304_v6 }
 0x24f   : > { %v473_v46 = vpop.f32.mrf.mxu1 }
 0x250   : > { %v474_v47 = vadd.f32 %v991_v45, %v473_v46 }
 0x251   : > { %v1140_v48 = vpop.f32.mrf.mxu1 }
 0x252   : > { %v479_v49 = vmul.f32 %v474_v47, %v474_v47 }
 0x253   : > { %v476_v50 = vpop.f32.mrf.mxu1 }
 0x254   : > { %v480_v51 = vmul.f32 %v479_v49, %v474_v47 }
 0x255   : > { %v1141_v52 = vpop.f32.mrf.mxu1 }
 0x256   : > { %v481_v53 = vmul.f32 0.044715, %v480_v51  ;;  %v740_v52 = vstv %s1019_s9 }
 0x258   : > { %v482_v54 = vadd.f32 %v481_v53, %v474_v47 }
 0x25a   : > { %v483_v55 = vmul.f32 0.7978846, %v482_v54 }
 0x25c   : > { %1313 = vtanh.f32 %v483_v55 }
 0x269   : > { %v1314_v56 = vpop.eup %1313 }
 0x26a   : > { %v485_v57 = vadd.f32 1.0, %v1314_v56 }
 0x26c   : > { %v486_v58 = vmul.f32 0.5, %v485_v57  ;;  %v1020_v57 = vld [vmem:[%s1725_s3 + $0x3] ss:$0 sm:$0xff] }
 0x26e   : > { %v487_v59 = vmul.f32 %v486_v58, %v474_v47 }
 0x270   : > { %v488_v60 = vmul.f32 %v487_v59, %v1643_v32 }
 0x272   : > { %v493_v61 = vpack.c.bf16 %v488_v60, %v488_v60  ;;  %v491_v26 = vmul.f32 %v490_v22, %v488_v60 }
 0x274   : > { %1159 = vmatmul.mubr.bf16.vlgmr.msra.gmra.mxu0 %v493_v61 }
 0x275   : > { %1198 = vmatprep.mubr.msk.bf16.mxu0 %vm1471_vm0, %v1470_v2  ;;  %1183 = vmatpush3.bf16.msra.mxu0 %v1305_v29 }
 0x276   : > { %1184 = vmatprep.subr.bf16.mxu0 %v1470_v2 }
 0x279   : > { %1185 = vmatpush3.bf16.msra.mxu0 %v1306_v30 }
 0x27a   : > { %1186 = vmatprep.subr.bf16.mxu0 %v1470_v2 }
 0x27d   : > { %1187 = vmatpush3.bf16.msra.mxu0 %v1307_v31 }
 0x27e   : > { %1188 = vmatprep.subr.bf16.mxu0 %v1470_v2 }
 0x281   : > { %1189 = vmatpush3.bf16.msra.mxu0 %v1308_v33 }
 0x282   : > { %1190 = vmatprep.subr.bf16.mxu0 %v1470_v2 }
 0x285   : > { %1191 = vmatpush3.bf16.msra.mxu0 %v1309_v34 }
 0x286   : > { %1192 = vmatprep.subr.bf16.mxu0 %v1470_v2 }
 0x289   : > { %1193 = vmatpush3.bf16.msra.mxu0 %v1310_v35 }
 0x28a   : > { %1194 = vmatprep.subr.bf16.mxu0 %v1470_v2 }
 0x28d   : > { %1195 = vmatpush3.bf16.msra.mxu0 %v1311_v36 }
 0x28e   : > { %1196 = vmatprep.subr.bf16.mxu0 %v1470_v2 }
 0x291   : > { %1197 = vmatpush3.bf16.msra.mxu0 %v1312_v37 }
 0x334   : > { %v598_v8 = vpop.f32.mrf.mxu0 }
 0x335   : > { %v599_v9 = vadd.f32 %v1000_v7, %v598_v8 }
 0x336   : > { %v1160_v10 = vpop.f32.mrf.mxu0 }
 0x337   : > { %v604_v11 = vmul.f32 %v599_v9, %v599_v9 }
 0x338   : > { %v601_v12 = vpop.f32.mrf.mxu0 }
 0x339   : > { %v605_v13 = vmul.f32 %v604_v11, %v599_v9 }
 0x33a   : > { %v1161_v14 = vpop.f32.mrf.mxu0 }
 0x33b   : > { %v606_v15 = vmul.f32 0.044715, %v605_v13 }
 0x33d   : > { %v607_v16 = vadd.f32 %v606_v15, %v599_v9 }
 0x33f   : > { %v608_v17 = vmul.f32 0.7978846, %v607_v16 }
 0x341   : > { %1315 = vtanh.f32 %v608_v17 }
 0x34e   : > { %v1316_v18 = vpop.eup %1315 }
 0x34f   : > { %v610_v19 = vadd.f32 1.0, %v1316_v18 }
 0x351   : > { %v611_v20 = vmul.f32 0.5, %v610_v19 }
 0x353   : > { %v612_v21 = vmul.f32 %v611_v20, %v599_v9  ;;  %v865_v9 = vstv %s1029_s30 }
 0x355   : > { %v613_v24 = vmul.f32 %v612_v21, %v1643_v32 }
 0x357   : > { %v618_v25 = vpack.c.bf16 %v613_v24, %v613_v24  ;;  %v616_v27 = vmul.f32 %v615_v23, %v613_v24 }
 0x359   : > { %1179 = vmatmul.mubr.bf16.vlgmr.msra.gmra.mxu1 %v618_v25  ;;  %v617_v28 = vadd.f32 %v616_v27, %v491_v26 }
 0x419   : > { %v723_v39 = vpop.f32.mrf.mxu1 }
 0x41a   : > { %v724_v40 = vadd.f32 %v1010_v38, %v723_v39 }
 0x41b   : > { %v1180_v41 = vpop.f32.mrf.mxu1 }
 0x41c   : > { %v729_v42 = vmul.f32 %v724_v40, %v724_v40 }
 0x41d   : > { %v726_v43 = vpop.f32.mrf.mxu1 }
 0x41e   : > { %v730_v44 = vmul.f32 %v729_v42, %v724_v40 }
 0x41f   : > { %v1181_v45 = vpop.f32.mrf.mxu1 }
 0x420   : > { %v731_v46 = vmul.f32 0.044715, %v730_v44 }
 0x422   : > { %v732_v47 = vadd.f32 %v731_v46, %v724_v40 }
 0x424   : > { %v733_v48 = vmul.f32 0.7978846, %v732_v47 }
 0x426   : > { %1317 = vtanh.f32 %v733_v48 }
 0x433   : > { %v1318_v49 = vpop.eup %1317 }
 0x434   : > { %v735_v2 = vadd.f32 1.0, %v1318_v49 }
 0x436   : > { %v736_v50 = vmul.f32 0.5, %v735_v2 }
 0x438   : > { %v737_v51 = vmul.f32 %v736_v50, %v724_v40 }
 0x43a   : > { %v738_v53 = vmul.f32 %v737_v51, %v1643_v32 }
 0x43c   : > { %v743_v54 = vpack.c.bf16 %v738_v53, %v738_v53  ;;  %v741_v55 = vmul.f32 %v740_v52, %v738_v53 }
 0x43e   : > { %1199 = vmatmul.mubr.bf16.vlgmr.msra.gmra.mxu0 %v743_v54  ;;  %v742_v56 = vadd.f32 %v741_v55, %v617_v28 }
 0x4fe   : > { %v848_v58 = vpop.f32.mrf.mxu0 }
 0x4ff   : > { %v849_v59 = vadd.f32 %v1020_v57, %v848_v58 }
 0x500   : > { %v1200_v60 = vpop.f32.mrf.mxu0 }
 0x501   : > { %v854_v61 = vmul.f32 %v849_v59, %v849_v59 }
 0x502   : > { %v851_v62 = vpop.f32.mrf.mxu0 }
 0x503   : > { %v855_v63 = vmul.f32 %v854_v61, %v849_v59 }
 0x504   : > { %v1201_v0 = vpop.f32.mrf.mxu0 }
 0x505   : > { %v856_v1 = vmul.f32 0.044715, %v855_v63 }
 0x507   : > { %v857_v3 = vadd.f32 %v856_v1, %v849_v59 }
 0x509   : > { %v858_v4 = vmul.f32 0.7978846, %v857_v3 }
 0x50b   : > { %1319 = vtanh.f32 %v858_v4 }
 0x518   : > { %v1320_v5 = vpop.eup %1319 }
 0x519   : > { %v860_v6 = vadd.f32 1.0, %v1320_v5 }
 0x51b   : > { %v861_v7 = vmul.f32 0.5, %v860_v6 }
 0x51d   : > { %v862_v8 = vmul.f32 %v861_v7, %v849_v59 }
 0x51f   : > { %v863_v10 = vmul.f32 %v862_v8, %v1643_v32 }
 0x521   : > { %v866_v11 = vmul.f32 %v865_v9, %v863_v10 }
 0x523   : > { %v867_v12 = vadd.f32 %v866_v11, %v742_v56 }
 0x525   : > { %868 = vst [vmem:[%s259_s14] sm:$0xff] %v867_v12 }
 0x526   : > { %1401 = shalt.err (!%p1398_p1)
}
 0x527   : > { %s1402_s9 = scalar_lea.hbm %s881_s23, 128  ;;  %s1406_s30 = scalar_lea.hbm %s1727_s5, 256 }
 0x528   : > { %p1403_p3 = scmp.ne.s32.totalorder %s881_s23, %s1402_s9  ;;  %p1407_p4 = scmp.lt.s32.totalorder %s881_s23, %s1727_s5 }
 0x529   : > { %p1408_p12 = scmp.lt.s32.totalorder %s1406_s30, %s1402_s9 }
 0x52a   : > { %p1404_p13 = pnand %p1403_p3, %p1542_p5 }
 0x52b   : > { %p1409_p10 = por %p1408_p12, %p1407_p4 }
 0x52c   : > { %p1405_p2 = pneg %p1404_p13 }
 0x52e   : > { %p1410_p6 = pnand %p1409_p10, %p1405_p2 }
 0x530   : > { %1413 = shalt.err (!%p1410_p6)
}
 0x531   : > { %1214 = dma.vmem_to_hbm [thread:$0]  (%p1542_p5), %s884_s15, 128, %s881_s23, %s870_s25  }
 0x532 PF: > { %p1236_p9 = scmp.ge.s32.totalorder %s1460_s21, 2  ;;  %s895_s13 = sand.u32 1, %s1448_s18  }
 0x533   : > { %p1739_p7 = scmp.ne.s32.totalorder %s1730_s29, 0  ;;  %s896_s14 = scalar_lea.sflag [#allocation4], %s895_s13 }
 0x535   : > { %p1227_p8 = pnand %p1236_p9, %p1739_p7 }
 0x537   : > { %p1228_p11 = pneg %p1227_p8 }
 0x539   : > { %1443 = dma.done.wait (%p1228_p11), %s896_s14, 128  }
 0x53a   : > { %1445 = vsyncadd (%p1228_p11), %s896_s14, 4294967168  ;;  %p18_p0 = scmp.ge.s32.totalorder %s1529_s24, 4   ;;  %s1740_s18 = smov %s1452_s19 }
 0x53b   : > { %s1741_s19 = smov %s1456_s20  ;;  %s1742_s20 = smov %s1540_s27 }
 0x53c   : > { %s1743_s21 = smov %s1529_s24  ;;  %20 = sbr.rel (!%p18_p0) target bundleno = 6 (0x6), region = 92 }
 0x541   :  { %901 = vsyncpa [#allocation3], 1 }
 0x542   :  { %903 = vsyncpa [#allocation3 + $0x1], 1 }
 0x543   :  { %904 = vsyncpa [#allocation7], 1 }
 0x544   :  { %905 = vsyncpa [#allocation4], 1 }
 0x545   :  { %907 = vsyncpa [#allocation4 + $0x1], 1 }
 0x546   :  { %908 = vsyncpa [#allocation5], 1 }
 0x547   :  { %910 = vsyncpa [#allocation5 + $0x1], 1 }

</bundles_post_ra>
